<compile_context>
chip_gen: v6e
topology: v6e:2x2x1
jax: 0.10.0
libtpu: 0.0.40
codegen_flags: <defaults>
</compile_context>

<pallas_src>
import math

import jax
import jax.numpy as jnp
from jax.experimental import pallas as pl
from jax.experimental.pallas import tpu as pltpu


_HALF_LOG_2PI = 0.5 * math.log(2.0 * math.pi)


# ----------------------------------------------------------------------------
# Window weights (mirrors KLInference.aggregate_data) -- K Python floats each,
# cached per (agg, lvl) in the model; no O(N^2) matrices, no device uploads.
# ----------------------------------------------------------------------------
def _window_weights(agg, k):
    if agg == 'sum':
        w_mu = [1.0 / k] * k
        w_var = [1.0 / (k * k)] * k
    elif agg == 'slope':
        if k == 1:
            w_mu = [1.0]
            w_var = [1.0]
        else:
            xs = [float(i) for i in range(k)]
            mean = sum(xs) / k
            sxx = sum((v - mean) ** 2 for v in xs)
            a = [(v - mean) / sxx for v in xs]
            w_mu = a
            w_var = [v * v for v in a]
    else:
        raise ValueError(agg)
    return tuple(w_mu), tuple(w_var)


# ----------------------------------------------------------------------------
# Fused Pallas kernel: all KL terms + the fallback log-prob objective.
# ----------------------------------------------------------------------------
def _build_fused_kernel(n_view_pairs, term_specs):
    """term_specs: tuple of (view_idx, K, w_mu tuple, w_var tuple) per term.

    Ref layout (all per batch-tile):
      refs[0]               x_mu   (bt, N)
      refs[1]               x_var  (bt, N)
      refs[2 : 2+2V]        per distinct K>1: x_mu_view (K, bt, M), x_var_view
      next 2T refs          per term: mu_t (bt, M_t), std_t (bt, M_t)
      refs[-2], refs[-1]    opt_loss / fallback_loss partials, (1, 1, 128)
    """
    n_terms = len(term_specs)

    def kernel(*refs):
        x_mu_ref, x_var_ref = refs[0], refs[1]
        view_refs = refs[2:2 + 2 * n_view_pairs]
        param_refs = refs[2 + 2 * n_view_pairs:2 + 2 * n_view_pairs + 2 * n_terms]
        opt_ref, fb_ref = refs[-2], refs[-1]

        x_mu = x_mu_ref[...]
        x_var = x_var_ref[...]

        opt_acc = jnp.zeros((1, 1), jnp.float32)
        fb_acc = jnp.zeros((1, 1), jnp.float32)

        # Static unroll over the (aggregate, level) terms.
        for t, (vidx, k, w_mu, w_var) in enumerate(term_specs):
            mu = param_refs[2 * t][...]
            std = param_refs[2 * t + 1][...]

            if k == 1:
                # Identity aggregation (sum/slope with K == 1): no matmul,
                # operate directly on x_mu / x_var.
                xmu_agg = x_mu
                xvar_agg = x_var
            else:
                # Weighted window reduce on the VPU: sum_k w[k] * view[k],
                # where view[k] is the contiguous (bt, M) slab of in-window
                # offset k (built once in the wrapper).
                xv_mu_ref = view_refs[2 * vidx]
                xv_var_ref = view_refs[2 * vidx + 1]
                xmu_agg = w_mu[0] * xv_mu_ref[0]
                xvar_agg = w_var[0] * xv_var_ref[0]
                for kk in range(1, k):
                    xmu_agg = xmu_agg + w_mu[kk] * xv_mu_ref[kk]
                    xvar_agg = xvar_agg + w_var[kk] * xv_var_ref[kk]

            # Shared sub-expressions for the KL and log-prob terms.
            log_std = jnp.log(std)
            inv_two_var = pl.reciprocal(2.0 * std * std, approx=True)
            diff2 = (mu - xmu_agg) ** 2

            # KL( N(xmu_agg, xvar_agg) || N(mu, std^2) )
            kl = (log_std - 0.5 * jnp.log(xvar_agg)
                  + (xvar_agg + diff2) * inv_two_var - 0.5)
            opt_acc = opt_acc + jnp.sum(kl, axis=(0, 1), keepdims=True)

            # Negative Gaussian log-prob (solver-fallback objective):
            #   -log N(xmu_agg; mu, std) = log(std) + 0.5*log(2*pi)
            #                              + (xmu_agg - mu)^2 / (2 std^2)
            nlp = log_std + _HALF_LOG_2PI + diff2 * inv_two_var
            fb_acc = fb_acc + jnp.sum(nlp, axis=(0, 1), keepdims=True)

        # Lane-dense scalar writeback (avoids masked partial stores).
        opt_ref[...] = jnp.broadcast_to(opt_acc.reshape(1, 1, 1), opt_ref.shape)
        fb_ref[...] = jnp.broadcast_to(fb_acc.reshape(1, 1, 1), fb_ref.shape)

    return kernel


# ----------------------------------------------------------------------------
# Wrapper: one pallas_call, batch-parallel grid.
# ----------------------------------------------------------------------------
def fused_kl_and_logprob_loss(x_mu, x_var, views, term_params, term_specs):
    """Returns (opt_loss (1,1), fallback_loss (1,1)) from a single fused kernel.

    views:        list of (x_mu_view, x_var_view), each (K, bs, N//K)
    term_params:  list of (mu_t, std_t), each (bs, M_t)
    term_specs:   tuple of (view_idx, K, w_mu, w_var) per term (static)
    """
    bs, n = x_mu.shape
    bt = 8 if (bs % 8 == 0 and bs > 8) else bs      # batch tile
    grid = (bs // bt,)
    g = grid[0]

    in_specs = [pl.BlockSpec((bt, n), lambda b: (b, 0)),
                pl.BlockSpec((bt, n), lambda b: (b, 0))]
    inputs = [x_mu, x_var]

    for xv_mu, xv_var in views:
        k, _, m = xv_mu.shape
        spec = pl.BlockSpec((k, bt, m), lambda b: (0, b, 0))
        in_specs += [spec, spec]
        inputs += [xv_mu, xv_var]

    for mu_t, std_t in term_params:
        m_t = mu_t.shape[1]
        spec = pl.BlockSpec((bt, m_t), lambda b: (b, 0))
        in_specs += [spec, spec]
        inputs += [mu_t, std_t]

    out_shape = (jax.ShapeDtypeStruct((g, 1, 128), jnp.float32),
                 jax.ShapeDtypeStruct((g, 1, 128), jnp.float32))
    out_specs = (pl.BlockSpec((1, 1, 128), lambda b: (b, 0, 0)),
                 pl.BlockSpec((1, 1, 128), lambda b: (b, 0, 0)))

    kernel = _build_fused_kernel(len(views), tuple(term_specs))

    opt_p, fb_p = pl.pallas_call(
        kernel,
        grid=grid,
        in_specs=in_specs,
        out_specs=out_specs,
        out_shape=out_shape,
        compiler_params=pltpu.CompilerParams(
            dimension_semantics=("parallel",)),   # shards batch tiles over v7x's 2 TCs
    )(*inputs)

    opt_loss = jnp.sum(opt_p[:, 0, 0]).reshape(1, 1)
    fb_loss = jnp.sum(fb_p[:, 0, 0]).reshape(1, 1)
    return opt_loss, fb_loss


# ----------------------------------------------------------------------------
# KLInference forward (JAX/Pallas)
# ----------------------------------------------------------------------------
class KLInferencePallas:
    def __init__(self, K_list, aggregates, opt_normspace=False):
        self.K_list = K_list
        self.aggregates = aggregates
        self.opt_normspace = opt_normspace
        # Cache the K-length window weight vectors per (agg, lvl) once.
        self._weights = {(agg, lvl): _window_weights(agg, lvl)
                         for agg in aggregates for lvl in K_list}

    def _active_terms(self):
        # Mirrors the PyTorch loop-skip logic: lvl==1 is only processed for the
        # first aggregate (base_lvl_present for every subsequent aggregate).
        terms = []
        n_seen = 0
        for agg in self.aggregates:
            n_seen += 1
            for lvl in self.K_list:
                if lvl == 1 and n_seen > 1:
                    continue
                terms.append((agg, lvl))
        return terms

    def forward(self, params_dict, which_split='test'):
        base_lvl = self.aggregates[0]
        base_means = params_dict[base_lvl][1][0]           # (bs, N, 1)
        base_stds = params_dict[base_lvl][1][1]            # (bs, N, 1)
        bs, n = base_means.shape[0], base_means.shape[1]

        # TODO(synk): the cvxpy Minimize(KL) + prob.solve() of the original has
        # no Pallas equivalent; use the closed-form per-element minimizer of the
        # base-level KL term (x_mu = mu, x_var = max(std^2, 1e-6), honoring the
        # x_var >= 1e-6 constraint) as the candidate and evaluate the full
        # hierarchical KL / fallback log-prob objectives with the fused kernel.
        x_mu = base_means[..., 0]                          # (bs, N)
        x_var = jnp.maximum(base_stds[..., 0] ** 2, 1e-6)  # (bs, N)

        terms = self._active_terms()

        # One swizzled (K, bs, N//K) view of x_mu / x_var per distinct K>1
        # (pure layout plumbing in XLA; shared by all terms with that K).
        distinct_ks = sorted({lvl for (_, lvl) in terms if lvl > 1})
        view_index = {k: i for i, k in enumerate(distinct_ks)}
        views = []
        for k in distinct_ks:
            m = n // k
            views.append((jnp.transpose(x_mu.reshape(bs, m, k), (2, 0, 1)),
                          jnp.transpose(x_var.reshape(bs, m, k), (2, 0, 1))))

        term_specs, term_params = [], []
        for agg, lvl in terms:
            w_mu, w_var = self._weights[(agg, lvl)]
            term_specs.append((view_index.get(lvl, -1), lvl, w_mu, w_var))
            means, stds = params_dict[agg][lvl][0], params_dict[agg][lvl][1]
            term_params.append((means[..., 0], stds[..., 0]))

        opt_loss, fallback_loss = fused_kl_and_logprob_loss(
            x_mu, x_var, views, term_params, term_specs)

        all_preds_mu = x_mu[..., None]                     # (bs, N, 1)
        all_preds_std = jnp.sqrt(x_var)[..., None]         # (bs, N, 1)

        # TODO(synk): norms[...].normalize / unnormalize (external normalizer
        # object indexed by ids) has no in-script definition; treated as identity.

        d = params_dict[base_lvl][1][2]
        v = params_dict[base_lvl][1][3]
        return all_preds_mu, d, v, all_preds_std, opt_loss, fallback_loss


# ----------------------------------------------------------------------------
# Main
# ----------------------------------------------------------------------------
if __name__ == "__main__":
    K_list = [1, 4]
    aggregates = ['sum', 'slope']
    bs, N = 16, 16

    key = jax.random.PRNGKey(0)
    params_dict = {}
    for agg in aggregates:
        params_dict[agg] = {}
        for lvl in K_list:
            m = N // lvl
            key, k1, k2 = jax.random.split(key, 3)
            # Synthetic, deterministic stand-ins for the base models' outputs:
            means = jax.random.normal(k1, (bs, m, 1), jnp.float32)
            stds = jnp.abs(jax.random.normal(k2, (bs, m, 1), jnp.float32)) + 0.1
            d = jnp.ones((bs, m, 1), jnp.float32) * 1e-9
            v = jnp.ones((bs, m, 1), jnp.float32) * 1e-9
            params_dict[agg][lvl] = [means, stds, d, v]

    model = KLInferencePallas(K_list, aggregates, opt_normspace=False)
    outs = model.forward(params_dict, which_split='test')
    all_preds_mu, d, v, all_preds_std, opt_loss, fallback_loss = outs
    jax.block_until_ready(outs)

    assert all_preds_mu.shape == (bs, N, 1)
    assert all_preds_std.shape == (bs, N, 1)
    assert d.shape == (bs, N, 1) and v.shape == (bs, N, 1)
    assert opt_loss.shape == (1, 1) and fallback_loss.shape == (1, 1)
    assert bool(jnp.isfinite(opt_loss).all()) and bool(jnp.isfinite(fallback_loss).all())
    print("KERNEL_OK")
</pallas_src>

<mosaic_0001>
module attributes {stable_mosaic.version = 11 : i64} {
  func.func @kernel(%arg0: i32, %arg1: memref<8x16xf32, #tpu.memory_space<vmem>>, %arg2: memref<8x16xf32, #tpu.memory_space<vmem>>, %arg3: memref<4x8x4xf32, #tpu.memory_space<vmem>>, %arg4: memref<4x8x4xf32, #tpu.memory_space<vmem>>, %arg5: memref<8x16xf32, #tpu.memory_space<vmem>>, %arg6: memref<8x16xf32, #tpu.memory_space<vmem>>, %arg7: memref<8x4xf32, #tpu.memory_space<vmem>>, %arg8: memref<8x4xf32, #tpu.memory_space<vmem>>, %arg9: memref<8x4xf32, #tpu.memory_space<vmem>>, %arg10: memref<8x4xf32, #tpu.memory_space<vmem>>, %arg11: memref<1x1x128xf32, #tpu.memory_space<vmem>>, %arg12: memref<1x1x128xf32, #tpu.memory_space<vmem>>) attributes {dimension_semantics = [#tpu.dimension_semantics<parallel>], iteration_bounds = array<i64: 2>, scalar_prefetch = 0 : i64, scratch_operands = 0 : i64, tpu.core_type = #tpu.core_type<tc>, window_params = [{transform_indices = @transform_0, window_bounds = array<i64: 8, 16>}, {transform_indices = @transform_1, window_bounds = array<i64: 8, 16>}, {transform_indices = @transform_2, window_bounds = array<i64: 4, 8, 4>}, {transform_indices = @transform_3, window_bounds = array<i64: 4, 8, 4>}, {transform_indices = @transform_4, window_bounds = array<i64: 8, 16>}, {transform_indices = @transform_5, window_bounds = array<i64: 8, 16>}, {transform_indices = @transform_6, window_bounds = array<i64: 8, 4>}, {transform_indices = @transform_7, window_bounds = array<i64: 8, 4>}, {transform_indices = @transform_8, window_bounds = array<i64: 8, 4>}, {transform_indices = @transform_9, window_bounds = array<i64: 8, 4>}, {transform_indices = @transform_10, window_bounds = array<i64: 1, 1, 128>}, {transform_indices = @transform_11, window_bounds = array<i64: 1, 1, 128>}]} {
    %c0 = arith.constant 0 : index
    %c0_0 = arith.constant 0 : index
    %0 = vector.load %arg1[%c0, %c0_0] : memref<8x16xf32, #tpu.memory_space<vmem>>, vector<8x16xf32>
    %c0_1 = arith.constant 0 : index
    %c0_2 = arith.constant 0 : index
    %1 = vector.load %arg2[%c0_1, %c0_2] : memref<8x16xf32, #tpu.memory_space<vmem>>, vector<8x16xf32>
    %cst = arith.constant 0.000000e+00 : f32
    %2 = vector.broadcast %cst : f32 to vector<1x1xf32>
    %cst_3 = arith.constant 0.000000e+00 : f32
    %3 = vector.broadcast %cst_3 : f32 to vector<1x1xf32>
    %c0_4 = arith.constant 0 : index
    %c0_5 = arith.constant 0 : index
    %4 = vector.load %arg5[%c0_4, %c0_5] : memref<8x16xf32, #tpu.memory_space<vmem>>, vector<8x16xf32>
    %c0_6 = arith.constant 0 : index
    %c0_7 = arith.constant 0 : index
    %5 = vector.load %arg6[%c0_6, %c0_7] : memref<8x16xf32, #tpu.memory_space<vmem>>, vector<8x16xf32>
    %6 = math.log %5 : vector<8x16xf32>
    %cst_8 = arith.constant 2.000000e+00 : f32
    %7 = vector.broadcast %cst_8 : f32 to vector<8x16xf32>
    %8 = arith.mulf %7, %5 : vector<8x16xf32>
    %9 = arith.mulf %8, %5 : vector<8x16xf32>
    %10 = tpu.reciprocal %9 {approx = true} : vector<8x16xf32> -> vector<8x16xf32>
    %11 = arith.subf %4, %0 : vector<8x16xf32>
    %12 = arith.mulf %11, %11 : vector<8x16xf32>
    %13 = math.log %1 : vector<8x16xf32>
    %cst_9 = arith.constant 5.000000e-01 : f32
    %14 = vector.broadcast %cst_9 : f32 to vector<8x16xf32>
    %15 = arith.mulf %14, %13 : vector<8x16xf32>
    %16 = arith.subf %6, %15 : vector<8x16xf32>
    %17 = arith.addf %1, %12 : vector<8x16xf32>
    %18 = arith.mulf %17, %10 : vector<8x16xf32>
    %19 = arith.addf %16, %18 : vector<8x16xf32>
    %cst_10 = arith.constant 5.000000e-01 : f32
    %20 = vector.broadcast %cst_10 : f32 to vector<8x16xf32>
    %21 = arith.subf %19, %20 : vector<8x16xf32>
    %22 = vector.shape_cast %21 : vector<8x16xf32> to vector<1x8x16xf32>
    %cst_11 = arith.constant dense<0.000000e+00> : vector<1xf32>
    %23 = vector.multi_reduction <add>, %22, %cst_11 [1, 2] : vector<1x8x16xf32> to vector<1xf32>
    %24 = vector.shape_cast %23 : vector<1xf32> to vector<1x1x1xf32>
    %25 = vector.extract %24[0, 0, 0] : f32 from vector<1x1x1xf32>
    %26 = vector.broadcast %25 : f32 to vector<1x1xf32>
    %27 = arith.addf %2, %26 : vector<1x1xf32>
    %cst_12 = arith.constant 0.918938517 : f32
    %28 = vector.broadcast %cst_12 : f32 to vector<8x16xf32>
    %29 = arith.addf %6, %28 : vector<8x16xf32>
    %30 = arith.mulf %12, %10 : vector<8x16xf32>
    %31 = arith.addf %29, %30 : vector<8x16xf32>
    %32 = vector.shape_cast %31 : vector<8x16xf32> to vector<1x8x16xf32>
    %cst_13 = arith.constant dense<0.000000e+00> : vector<1xf32>
    %33 = vector.multi_reduction <add>, %32, %cst_13 [1, 2] : vector<1x8x16xf32> to vector<1xf32>
    %34 = vector.shape_cast %33 : vector<1xf32> to vector<1x1x1xf32>
    %35 = vector.extract %34[0, 0, 0] : f32 from vector<1x1x1xf32>
    %36 = vector.broadcast %35 : f32 to vector<1x1xf32>
    %37 = arith.addf %3, %36 : vector<1x1xf32>
    %c0_14 = arith.constant 0 : index
    %c0_15 = arith.constant 0 : index
    %38 = vector.load %arg7[%c0_14, %c0_15] : memref<8x4xf32, #tpu.memory_space<vmem>>, vector<8x4xf32>
    %c0_16 = arith.constant 0 : index
    %c0_17 = arith.constant 0 : index
    %39 = vector.load %arg8[%c0_16, %c0_17] : memref<8x4xf32, #tpu.memory_space<vmem>>, vector<8x4xf32>
    %c0_18 = arith.constant 0 : index
    %c0_19 = arith.constant 0 : index
    %c0_20 = arith.constant 0 : index
    %40 = vector.load %arg3[%c0_18, %c0_19, %c0_20] : memref<4x8x4xf32, #tpu.memory_space<vmem>>, vector<1x8x4xf32>
    %41 = vector.shape_cast %40 : vector<1x8x4xf32> to vector<8x4xf32>
    %cst_21 = arith.constant 2.500000e-01 : f32
    %42 = vector.broadcast %cst_21 : f32 to vector<8x4xf32>
    %43 = arith.mulf %42, %41 : vector<8x4xf32>
    %c0_22 = arith.constant 0 : index
    %c0_23 = arith.constant 0 : index
    %c0_24 = arith.constant 0 : index
    %44 = vector.load %arg4[%c0_22, %c0_23, %c0_24] : memref<4x8x4xf32, #tpu.memory_space<vmem>>, vector<1x8x4xf32>
    %45 = vector.shape_cast %44 : vector<1x8x4xf32> to vector<8x4xf32>
    %cst_25 = arith.constant 6.250000e-02 : f32
    %46 = vector.broadcast %cst_25 : f32 to vector<8x4xf32>
    %47 = arith.mulf %46, %45 : vector<8x4xf32>
    %c1 = arith.constant 1 : index
    %c0_26 = arith.constant 0 : index
    %c0_27 = arith.constant 0 : index
    %48 = vector.load %arg3[%c1, %c0_26, %c0_27] : memref<4x8x4xf32, #tpu.memory_space<vmem>>, vector<1x8x4xf32>
    %49 = vector.shape_cast %48 : vector<1x8x4xf32> to vector<8x4xf32>
    %cst_28 = arith.constant 2.500000e-01 : f32
    %50 = vector.broadcast %cst_28 : f32 to vector<8x4xf32>
    %51 = arith.mulf %50, %49 : vector<8x4xf32>
    %52 = arith.addf %43, %51 : vector<8x4xf32>
    %c1_29 = arith.constant 1 : index
    %c0_30 = arith.constant 0 : index
    %c0_31 = arith.constant 0 : index
    %53 = vector.load %arg4[%c1_29, %c0_30, %c0_31] : memref<4x8x4xf32, #tpu.memory_space<vmem>>, vector<1x8x4xf32>
    %54 = vector.shape_cast %53 : vector<1x8x4xf32> to vector<8x4xf32>
    %cst_32 = arith.constant 6.250000e-02 : f32
    %55 = vector.broadcast %cst_32 : f32 to vector<8x4xf32>
    %56 = arith.mulf %55, %54 : vector<8x4xf32>
    %57 = arith.addf %47, %56 : vector<8x4xf32>
    %c2 = arith.constant 2 : index
    %c0_33 = arith.constant 0 : index
    %c0_34 = arith.constant 0 : index
    %58 = vector.load %arg3[%c2, %c0_33, %c0_34] : memref<4x8x4xf32, #tpu.memory_space<vmem>>, vector<1x8x4xf32>
    %59 = vector.shape_cast %58 : vector<1x8x4xf32> to vector<8x4xf32>
    %cst_35 = arith.constant 2.500000e-01 : f32
    %60 = vector.broadcast %cst_35 : f32 to vector<8x4xf32>
    %61 = arith.mulf %60, %59 : vector<8x4xf32>
    %62 = arith.addf %52, %61 : vector<8x4xf32>
    %c2_36 = arith.constant 2 : index
    %c0_37 = arith.constant 0 : index
    %c0_38 = arith.constant 0 : index
    %63 = vector.load %arg4[%c2_36, %c0_37, %c0_38] : memref<4x8x4xf32, #tpu.memory_space<vmem>>, vector<1x8x4xf32>
    %64 = vector.shape_cast %63 : vector<1x8x4xf32> to vector<8x4xf32>
    %cst_39 = arith.constant 6.250000e-02 : f32
    %65 = vector.broadcast %cst_39 : f32 to vector<8x4xf32>
    %66 = arith.mulf %65, %64 : vector<8x4xf32>
    %67 = arith.addf %57, %66 : vector<8x4xf32>
    %c3 = arith.constant 3 : index
    %c0_40 = arith.constant 0 : index
    %c0_41 = arith.constant 0 : index
    %68 = vector.load %arg3[%c3, %c0_40, %c0_41] : memref<4x8x4xf32, #tpu.memory_space<vmem>>, vector<1x8x4xf32>
    %69 = vector.shape_cast %68 : vector<1x8x4xf32> to vector<8x4xf32>
    %cst_42 = arith.constant 2.500000e-01 : f32
    %70 = vector.broadcast %cst_42 : f32 to vector<8x4xf32>
    %71 = arith.mulf %70, %69 : vector<8x4xf32>
    %72 = arith.addf %62, %71 : vector<8x4xf32>
    %c3_43 = arith.constant 3 : index
    %c0_44 = arith.constant 0 : index
    %c0_45 = arith.constant 0 : index
    %73 = vector.load %arg4[%c3_43, %c0_44, %c0_45] : memref<4x8x4xf32, #tpu.memory_space<vmem>>, vector<1x8x4xf32>
    %74 = vector.shape_cast %73 : vector<1x8x4xf32> to vector<8x4xf32>
    %cst_46 = arith.constant 6.250000e-02 : f32
    %75 = vector.broadcast %cst_46 : f32 to vector<8x4xf32>
    %76 = arith.mulf %75, %74 : vector<8x4xf32>
    %77 = arith.addf %67, %76 : vector<8x4xf32>
    %78 = math.log %39 : vector<8x4xf32>
    %cst_47 = arith.constant 2.000000e+00 : f32
    %79 = vector.broadcast %cst_47 : f32 to vector<8x4xf32>
    %80 = arith.mulf %79, %39 : vector<8x4xf32>
    %81 = arith.mulf %80, %39 : vector<8x4xf32>
    %82 = tpu.reciprocal %81 {approx = true} : vector<8x4xf32> -> vector<8x4xf32>
    %83 = arith.subf %38, %72 : vector<8x4xf32>
    %84 = arith.mulf %83, %83 : vector<8x4xf32>
    %85 = math.log %77 : vector<8x4xf32>
    %cst_48 = arith.constant 5.000000e-01 : f32
    %86 = vector.broadcast %cst_48 : f32 to vector<8x4xf32>
    %87 = arith.mulf %86, %85 : vector<8x4xf32>
    %88 = arith.subf %78, %87 : vector<8x4xf32>
    %89 = arith.addf %77, %84 : vector<8x4xf32>
    %90 = arith.mulf %89, %82 : vector<8x4xf32>
    %91 = arith.addf %88, %90 : vector<8x4xf32>
    %cst_49 = arith.constant 5.000000e-01 : f32
    %92 = vector.broadcast %cst_49 : f32 to vector<8x4xf32>
    %93 = arith.subf %91, %92 : vector<8x4xf32>
    %94 = vector.shape_cast %93 : vector<8x4xf32> to vector<1x8x4xf32>
    %cst_50 = arith.constant dense<0.000000e+00> : vector<1xf32>
    %95 = vector.multi_reduction <add>, %94, %cst_50 [1, 2] : vector<1x8x4xf32> to vector<1xf32>
    %96 = vector.shape_cast %95 : vector<1xf32> to vector<1x1x1xf32>
    %97 = vector.extract %96[0, 0, 0] : f32 from vector<1x1x1xf32>
    %98 = vector.broadcast %97 : f32 to vector<1x1xf32>
    %99 = arith.addf %27, %98 : vector<1x1xf32>
    %cst_51 = arith.constant 0.918938517 : f32
    %100 = vector.broadcast %cst_51 : f32 to vector<8x4xf32>
    %101 = arith.addf %78, %100 : vector<8x4xf32>
    %102 = arith.mulf %84, %82 : vector<8x4xf32>
    %103 = arith.addf %101, %102 : vector<8x4xf32>
    %104 = vector.shape_cast %103 : vector<8x4xf32> to vector<1x8x4xf32>
    %cst_52 = arith.constant dense<0.000000e+00> : vector<1xf32>
    %105 = vector.multi_reduction <add>, %104, %cst_52 [1, 2] : vector<1x8x4xf32> to vector<1xf32>
    %106 = vector.shape_cast %105 : vector<1xf32> to vector<1x1x1xf32>
    %107 = vector.extract %106[0, 0, 0] : f32 from vector<1x1x1xf32>
    %108 = vector.broadcast %107 : f32 to vector<1x1xf32>
    %109 = arith.addf %37, %108 : vector<1x1xf32>
    %c0_53 = arith.constant 0 : index
    %c0_54 = arith.constant 0 : index
    %110 = vector.load %arg9[%c0_53, %c0_54] : memref<8x4xf32, #tpu.memory_space<vmem>>, vector<8x4xf32>
    %c0_55 = arith.constant 0 : index
    %c0_56 = arith.constant 0 : index
    %111 = vector.load %arg10[%c0_55, %c0_56] : memref<8x4xf32, #tpu.memory_space<vmem>>, vector<8x4xf32>
    %c0_57 = arith.constant 0 : index
    %c0_58 = arith.constant 0 : index
    %c0_59 = arith.constant 0 : index
    %112 = vector.load %arg3[%c0_57, %c0_58, %c0_59] : memref<4x8x4xf32, #tpu.memory_space<vmem>>, vector<1x8x4xf32>
    %113 = vector.shape_cast %112 : vector<1x8x4xf32> to vector<8x4xf32>
    %cst_60 = arith.constant -3.000000e-01 : f32
    %114 = vector.broadcast %cst_60 : f32 to vector<8x4xf32>
    %115 = arith.mulf %114, %113 : vector<8x4xf32>
    %c0_61 = arith.constant 0 : index
    %c0_62 = arith.constant 0 : index
    %c0_63 = arith.constant 0 : index
    %116 = vector.load %arg4[%c0_61, %c0_62, %c0_63] : memref<4x8x4xf32, #tpu.memory_space<vmem>>, vector<1x8x4xf32>
    %117 = vector.shape_cast %116 : vector<1x8x4xf32> to vector<8x4xf32>
    %cst_64 = arith.constant 9.000000e-02 : f32
    %118 = vector.broadcast %cst_64 : f32 to vector<8x4xf32>
    %119 = arith.mulf %118, %117 : vector<8x4xf32>
    %c1_65 = arith.constant 1 : index
    %c0_66 = arith.constant 0 : index
    %c0_67 = arith.constant 0 : index
    %120 = vector.load %arg3[%c1_65, %c0_66, %c0_67] : memref<4x8x4xf32, #tpu.memory_space<vmem>>, vector<1x8x4xf32>
    %121 = vector.shape_cast %120 : vector<1x8x4xf32> to vector<8x4xf32>
    %cst_68 = arith.constant -1.000000e-01 : f32
    %122 = vector.broadcast %cst_68 : f32 to vector<8x4xf32>
    %123 = arith.mulf %122, %121 : vector<8x4xf32>
    %124 = arith.addf %115, %123 : vector<8x4xf32>
    %c1_69 = arith.constant 1 : index
    %c0_70 = arith.constant 0 : index
    %c0_71 = arith.constant 0 : index
    %125 = vector.load %arg4[%c1_69, %c0_70, %c0_71] : memref<4x8x4xf32, #tpu.memory_space<vmem>>, vector<1x8x4xf32>
    %126 = vector.shape_cast %125 : vector<1x8x4xf32> to vector<8x4xf32>
    %cst_72 = arith.constant 0.00999999977 : f32
    %127 = vector.broadcast %cst_72 : f32 to vector<8x4xf32>
    %128 = arith.mulf %127, %126 : vector<8x4xf32>
    %129 = arith.addf %119, %128 : vector<8x4xf32>
    %c2_73 = arith.constant 2 : index
    %c0_74 = arith.constant 0 : index
    %c0_75 = arith.constant 0 : index
    %130 = vector.load %arg3[%c2_73, %c0_74, %c0_75] : memref<4x8x4xf32, #tpu.memory_space<vmem>>, vector<1x8x4xf32>
    %131 = vector.shape_cast %130 : vector<1x8x4xf32> to vector<8x4xf32>
    %cst_76 = arith.constant 1.000000e-01 : f32
    %132 = vector.broadcast %cst_76 : f32 to vector<8x4xf32>
    %133 = arith.mulf %132, %131 : vector<8x4xf32>
    %134 = arith.addf %124, %133 : vector<8x4xf32>
    %c2_77 = arith.constant 2 : index
    %c0_78 = arith.constant 0 : index
    %c0_79 = arith.constant 0 : index
    %135 = vector.load %arg4[%c2_77, %c0_78, %c0_79] : memref<4x8x4xf32, #tpu.memory_space<vmem>>, vector<1x8x4xf32>
    %136 = vector.shape_cast %135 : vector<1x8x4xf32> to vector<8x4xf32>
    %cst_80 = arith.constant 0.00999999977 : f32
    %137 = vector.broadcast %cst_80 : f32 to vector<8x4xf32>
    %138 = arith.mulf %137, %136 : vector<8x4xf32>
    %139 = arith.addf %129, %138 : vector<8x4xf32>
    %c3_81 = arith.constant 3 : index
    %c0_82 = arith.constant 0 : index
    %c0_83 = arith.constant 0 : index
    %140 = vector.load %arg3[%c3_81, %c0_82, %c0_83] : memref<4x8x4xf32, #tpu.memory_space<vmem>>, vector<1x8x4xf32>
    %141 = vector.shape_cast %140 : vector<1x8x4xf32> to vector<8x4xf32>
    %cst_84 = arith.constant 3.000000e-01 : f32
    %142 = vector.broadcast %cst_84 : f32 to vector<8x4xf32>
    %143 = arith.mulf %142, %141 : vector<8x4xf32>
    %144 = arith.addf %134, %143 : vector<8x4xf32>
    %c3_85 = arith.constant 3 : index
    %c0_86 = arith.constant 0 : index
    %c0_87 = arith.constant 0 : index
    %145 = vector.load %arg4[%c3_85, %c0_86, %c0_87] : memref<4x8x4xf32, #tpu.memory_space<vmem>>, vector<1x8x4xf32>
    %146 = vector.shape_cast %145 : vector<1x8x4xf32> to vector<8x4xf32>
    %cst_88 = arith.constant 9.000000e-02 : f32
    %147 = vector.broadcast %cst_88 : f32 to vector<8x4xf32>
    %148 = arith.mulf %147, %146 : vector<8x4xf32>
    %149 = arith.addf %139, %148 : vector<8x4xf32>
    %150 = math.log %111 : vector<8x4xf32>
    %cst_89 = arith.constant 2.000000e+00 : f32
    %151 = vector.broadcast %cst_89 : f32 to vector<8x4xf32>
    %152 = arith.mulf %151, %111 : vector<8x4xf32>
    %153 = arith.mulf %152, %111 : vector<8x4xf32>
    %154 = tpu.reciprocal %153 {approx = true} : vector<8x4xf32> -> vector<8x4xf32>
    %155 = arith.subf %110, %144 : vector<8x4xf32>
    %156 = arith.mulf %155, %155 : vector<8x4xf32>
    %157 = math.log %149 : vector<8x4xf32>
    %cst_90 = arith.constant 5.000000e-01 : f32
    %158 = vector.broadcast %cst_90 : f32 to vector<8x4xf32>
    %159 = arith.mulf %158, %157 : vector<8x4xf32>
    %160 = arith.subf %150, %159 : vector<8x4xf32>
    %161 = arith.addf %149, %156 : vector<8x4xf32>
    %162 = arith.mulf %161, %154 : vector<8x4xf32>
    %163 = arith.addf %160, %162 : vector<8x4xf32>
    %cst_91 = arith.constant 5.000000e-01 : f32
    %164 = vector.broadcast %cst_91 : f32 to vector<8x4xf32>
    %165 = arith.subf %163, %164 : vector<8x4xf32>
    %166 = vector.shape_cast %165 : vector<8x4xf32> to vector<1x8x4xf32>
    %cst_92 = arith.constant dense<0.000000e+00> : vector<1xf32>
    %167 = vector.multi_reduction <add>, %166, %cst_92 [1, 2] : vector<1x8x4xf32> to vector<1xf32>
    %168 = vector.shape_cast %167 : vector<1xf32> to vector<1x1x1xf32>
    %169 = vector.extract %168[0, 0, 0] : f32 from vector<1x1x1xf32>
    %170 = vector.broadcast %169 : f32 to vector<1x1xf32>
    %171 = arith.addf %99, %170 : vector<1x1xf32>
    %cst_93 = arith.constant 0.918938517 : f32
    %172 = vector.broadcast %cst_93 : f32 to vector<8x4xf32>
    %173 = arith.addf %150, %172 : vector<8x4xf32>
    %174 = arith.mulf %156, %154 : vector<8x4xf32>
    %175 = arith.addf %173, %174 : vector<8x4xf32>
    %176 = vector.shape_cast %175 : vector<8x4xf32> to vector<1x8x4xf32>
    %cst_94 = arith.constant dense<0.000000e+00> : vector<1xf32>
    %177 = vector.multi_reduction <add>, %176, %cst_94 [1, 2] : vector<1x8x4xf32> to vector<1xf32>
    %178 = vector.shape_cast %177 : vector<1xf32> to vector<1x1x1xf32>
    %179 = vector.extract %178[0, 0, 0] : f32 from vector<1x1x1xf32>
    %180 = vector.broadcast %179 : f32 to vector<1x1xf32>
    %181 = arith.addf %109, %180 : vector<1x1xf32>
    %182 = vector.shape_cast %171 : vector<1x1xf32> to vector<1x1x1xf32>
    %183 = vector.shape_cast %182 : vector<1x1x1xf32> to vector<1x1x1xf32>
    %184 = vector.broadcast %183 : vector<1x1x1xf32> to vector<1x1x128xf32>
    %c0_95 = arith.constant 0 : index
    %c0_96 = arith.constant 0 : index
    %c0_97 = arith.constant 0 : index
    %185 = vector.load %arg11[%c0_95, %c0_96, %c0_97] : memref<1x1x128xf32, #tpu.memory_space<vmem>>, vector<1x1x128xf32>
    tpu.vector_store %arg11[%c0_95, %c0_96, %c0_97], %184 {strides = array<i32>} : memref<1x1x128xf32, #tpu.memory_space<vmem>>, vector<1x1x128xf32>,
    %186 = vector.shape_cast %181 : vector<1x1xf32> to vector<1x1x1xf32>
    %187 = vector.shape_cast %186 : vector<1x1x1xf32> to vector<1x1x1xf32>
    %188 = vector.broadcast %187 : vector<1x1x1xf32> to vector<1x1x128xf32>
    %c0_98 = arith.constant 0 : index
    %c0_99 = arith.constant 0 : index
    %c0_100 = arith.constant 0 : index
    %189 = vector.load %arg12[%c0_98, %c0_99, %c0_100] : memref<1x1x128xf32, #tpu.memory_space<vmem>>, vector<1x1x128xf32>
    tpu.vector_store %arg12[%c0_98, %c0_99, %c0_100], %188 {strides = array<i32>} : memref<1x1x128xf32, #tpu.memory_space<vmem>>, vector<1x1x128xf32>,
    return
  }
  func.func @transform_0(%arg0: i32) -> (i32, i32) {
    %c0_i32 = arith.constant 0 : i32
    %c0_i32_0 = arith.constant 0 : i32
    return %arg0, %c0_i32 : i32, i32
  }
  func.func @transform_1(%arg0: i32) -> (i32, i32) {
    %c0_i32 = arith.constant 0 : i32
    %c0_i32_0 = arith.constant 0 : i32
    return %arg0, %c0_i32 : i32, i32
  }
  func.func @transform_2(%arg0: i32) -> (i32, i32, i32) {
    %c0_i32 = arith.constant 0 : i32
    %c0_i32_0 = arith.constant 0 : i32
    %c0_i32_1 = arith.constant 0 : i32
    return %c0_i32, %arg0, %c0_i32_0 : i32, i32, i32
  }
  func.func @transform_3(%arg0: i32) -> (i32, i32, i32) {
    %c0_i32 = arith.constant 0 : i32
    %c0_i32_0 = arith.constant 0 : i32
    %c0_i32_1 = arith.constant 0 : i32
    return %c0_i32, %arg0, %c0_i32_0 : i32, i32, i32
  }
  func.func @transform_4(%arg0: i32) -> (i32, i32) {
    %c0_i32 = arith.constant 0 : i32
    %c0_i32_0 = arith.constant 0 : i32
    return %arg0, %c0_i32 : i32, i32
  }
  func.func @transform_5(%arg0: i32) -> (i32, i32) {
    %c0_i32 = arith.constant 0 : i32
    %c0_i32_0 = arith.constant 0 : i32
    return %arg0, %c0_i32 : i32, i32
  }
  func.func @transform_6(%arg0: i32) -> (i32, i32) {
    %c0_i32 = arith.constant 0 : i32
    %c0_i32_0 = arith.constant 0 : i32
    return %arg0, %c0_i32 : i32, i32
  }
  func.func @transform_7(%arg0: i32) -> (i32, i32) {
    %c0_i32 = arith.constant 0 : i32
    %c0_i32_0 = arith.constant 0 : i32
    return %arg0, %c0_i32 : i32, i32
  }
  func.func @transform_8(%arg0: i32) -> (i32, i32) {
    %c0_i32 = arith.constant 0 : i32
    %c0_i32_0 = arith.constant 0 : i32
    return %arg0, %c0_i32 : i32, i32
  }
  func.func @transform_9(%arg0: i32) -> (i32, i32) {
    %c0_i32 = arith.constant 0 : i32
    %c0_i32_0 = arith.constant 0 : i32
    return %arg0, %c0_i32 : i32, i32
  }
  func.func @transform_10(%arg0: i32) -> (i32, i32, i32) {
    %c0_i32 = arith.constant 0 : i32
    %c0_i32_0 = arith.constant 0 : i32
    %c0_i32_1 = arith.constant 0 : i32
    return %arg0, %c0_i32, %c0_i32_0 : i32, i32, i32
  }
  func.func @transform_11(%arg0: i32) -> (i32, i32, i32) {
    %c0_i32 = arith.constant 0 : i32
    %c0_i32_0 = arith.constant 0 : i32
    %c0_i32_1 = arith.constant 0 : i32
    return %arg0, %c0_i32, %c0_i32_0 : i32, i32, i32
  }
}

</mosaic_0001>

<bundles_post_ra>
// kernel: tpu_custom_call.1
= control target key start
LH: loop header
LB: loop body
LE: loop exit
PB: predicated region body
PF: predicated region fallthrough
CT: control target
= control target key end

     0   :  { %s1513_s0 = inlined_call_operand.vmem [shape: f32[16,16], index: 0, kind: input, shape index: {}]   ;;  %s1514_s1 = inlined_call_operand.vmem [shape: f32[16,16], index: 1, kind: input, shape index: {}]   ;;  %s1515_s2 = inlined_call_operand.vmem [shape: f32[4,16,4], index: 2, kind: input, shape index: {}]   ;;  %s1516_s3 = inlined_call_operand.vmem [shape: f32[4,16,4], index: 3, kind: input, shape index: {}]   ;;  %s1517_s4 = inlined_call_operand.vmem [shape: f32[16,16], index: 4, kind: input, shape index: {}]   ;;  %s1518_s5 = inlined_call_operand.vmem [shape: f32[16,16], index: 5, kind: input, shape index: {}]   ;;  %s1519_s6 = inlined_call_operand.vmem [shape: f32[16,4], index: 6, kind: input, shape index: {}]   ;;  %s1520_s7 = inlined_call_operand.vmem [shape: f32[16,4], index: 7, kind: input, shape index: {}]   ;;  %s1521_s8 = inlined_call_operand.vmem [shape: f32[16,4], index: 8, kind: input, shape index: {}]   ;;  %s1522_s9 = inlined_call_operand.vmem [shape: f32[16,4], index: 9, kind: input, shape index: {}]   ;;  %s1523_s10 = inlined_call_operand.hbm [shape: f32[2,1,128], index: 10, kind: output, shape index: {0}]   ;;  %s1524_s11 = inlined_call_operand.hbm [shape: f32[2,1,128], index: 11, kind: output, shape index: {1}]  }
   0x1   :  { %1527 = sst [smem:[#allocation13_spill]] %s1515_s2 }
   0x2   :  { %1528 = sst [smem:[#allocation14_spill]] %s1516_s3 }
   0x3   :  { %17 = vsyncpa [#allocation5], 0 }
   0x4   :  { %19 = vsyncpa [#allocation5 + $0x1], 0 }
   0x5   :  { %20 = vsyncpa [#allocation7], 0 }
   0x6   :  { %22 = vsyncpa [#allocation7 + $0x1], 0  ;;  %s1316_s17 = smov 0   ;;  %s1318_s18 = smov 0  }
   0x7   :  { %s1320_s19 = smov 0   ;;  %s1322_s20 = smov 0  }
   0x8 LB: > { %1529 = sst [smem:[#allocation10_spill]] %s1244_s18  ;;  %s1337_s21 = sadd.s32 4294967295, %s1252_s20   ;;  %s1252_s20 = sphi %s1322_s20, %s1540_s20   ;;  %s1248_s19 = sphi %s1320_s19, %s1539_s19   ;;  %s1244_s18 = sphi %s1318_s18, %s1538_s18   ;;  %s1240_s17 = sphi %s1316_s17, %s1537_s17  }
   0x9   : > { %1530 = sst [smem:[#allocation11_spill]] %s1248_s19  ;;  %s1057_s22 = sadd.s32 4294967294, %s1252_s20  }
   0xa   : > { %s1341_s23 = sadd.s32 1, %s1252_s20   ;;  %s87_s24 = sadd.s32 1, %s1248_s19 }
   0xb   : > { %s84_s25 = ssub.s32 %s1252_s20, %s1341_s23  ;;  %p94_p0 = scmp.ne.s32.totalorder %s1248_s19, %s1244_s18 }
   0xc   : > { %p85_p1 = scmp.eq.s32.totalorder %s84_s25, 0  ;;  %p95_p2 = scmp.eq.s32.totalorder %s1252_s20, 0 }
   0xd   : > { %p306_p3 = scmp.eq.s32.totalorder %s1337_s21, 1  ;;  %p311_p4 = scmp.ne.s32.totalorder %s1244_s18, %s1240_s17 }
   0xe   : > { %s1353_s26 = scalar_select %p85_p1, %s1248_s19, %s87_s24  }
   0xf   : > { %p1355_p5 = por %p95_p2, %p94_p0  ;;  %p1359_p6 = por %p306_p3, %p94_p0 }
  0x10   : > { %1531 = sst [smem:[#allocation12_spill]] %s1353_s26  ;;  %p312_p7 = scmp.eq.s32.totalorder %s1057_s22, 1 }
  0x11   : > { %p1059_p9 = scmp.ge.s32.totalorder %s1252_s20, 2 }
  0x12   : > { %p1363_p8 = por %p312_p7, %p311_p4 }
  0x13   : > { %354 = sbr.rel (%p1059_p9) target bundleno = 48 (0x30), region = 16 }
  0x18   : > { %371 = sbr.rel (!%p1355_p5) target bundleno = 36 (0x24), region = 28  ;;  %s373_s30 = sand.u32 (%p1355_p5), 1, %s1248_s19  }
  0x19   : > { %s1061_s12 = sshll.u32 (%p1355_p5), %s1252_s20, 3  ;;  %s1060_s13 = sshll.u32 (%p1355_p5), %s373_s30, 5 }
  0x1a   : > { %s1535_s2 = sld [smem:[#allocation13_spill]] (%p1355_p5)  ;;  %s375_s22 = scalar_lea.vmem (%p1355_p5), [#allocation2], %s1060_s13 }
  0x20   : > { %s377_s16 = scalar_lea.vmem %s1535_s2, %s1061_s12 }
  0x21   : > { %v412_v0 = vld [vmem:[%s377_s16] sm:$0xff]  ;;  %v414_v1 = vld [vmem:[%s377_s16 + $0x10] sm:$0xff] }
  0x22   : > { %v416_v2 = vld [vmem:[%s377_s16 + $0x20] sm:$0xff]  ;;  %413 = vst [vmem:[%s375_s22] sm:$0xff] %v412_v0  ;;  %415 = vst [vmem:[%s375_s22 + $0x8] sm:$0xff] %v414_v1  ;;  %v418_v3 = vld [vmem:[%s377_s16 + $0x30] sm:$0xff] }
  0x23   : > { %417 = vst [vmem:[%s375_s22 + $0x10] sm:$0xff] %v416_v2  ;;  %419 = vst [vmem:[%s375_s22 + $0x18] sm:$0xff] %v418_v3 }
  0x24 PF: > { %425 = sbr.rel (!%p1355_p5) target bundleno = 48 (0x30), region = 66  ;;  %s427_s24 = sand.u32 (%p1355_p5), 1, %s1248_s19  }
  0x25   : > { %s1063_s25 = sshll.u32 (%p1355_p5), %s1252_s20, 3  ;;  %s1062_s30 = sshll.u32 (%p1355_p5), %s427_s24, 5 }
  0x26   : > { %s1536_s3 = sld [smem:[#allocation14_spill]] (%p1355_p5)  ;;  %s429_s13 = scalar_lea.vmem (%p1355_p5), [#allocation3], %s1062_s30 }
  0x2c   : > { %s431_s15 = scalar_lea.vmem %s1536_s3, %s1063_s25 }
  0x2d   : > { %v466_v4 = vld [vmem:[%s431_s15] sm:$0xff]  ;;  %v468_v5 = vld [vmem:[%s431_s15 + $0x10] sm:$0xff] }
  0x2e   : > { %v470_v6 = vld [vmem:[%s431_s15 + $0x20] sm:$0xff]  ;;  %467 = vst [vmem:[%s429_s13] sm:$0xff] %v466_v4  ;;  %469 = vst [vmem:[%s429_s13 + $0x8] sm:$0xff] %v468_v5  ;;  %v472_v7 = vld [vmem:[%s431_s15 + $0x30] sm:$0xff] }
  0x2f   : > { %471 = vst [vmem:[%s429_s13 + $0x10] sm:$0xff] %v470_v6  ;;  %473 = vst [vmem:[%s429_s13 + $0x18] sm:$0xff] %v472_v7 }
  0x30 PF: > { %p1064_p10 = scmp.ge.s32.totalorder %s1252_s20, 1  ;;  %p520_p11 = scmp.lt.s32.totalorder %s1252_s20, 3 }
  0x32   : > { %p521_p12 = pnand %p1064_p10, %p520_p11 }
  0x33   : > { %p612_p13 = scmp.lt.s32.totalorder (!%p521_p12), %s1337_s21, 1  ;;  %s1388_s27 = sand.u32 (!%p521_p12), 1, %s1244_s18  }
  0x34   : > { %524 = sbr.rel (%p521_p12) target bundleno = 340 (0x154), region = 128  ;;  %s1065_s16 = sshll.u32 (!%p521_p12), %s1388_s27, 5 }
  0x35   : > { %s529_s25 = scalar_lea.vmem (!%p521_p12), [#allocation2], %s1065_s16  ;;  %s536_s15 = scalar_lea.vmem (!%p521_p12), [#allocation3], %s1065_s16 }
  0x36   : > { %s1084_s14 = sshll.u32 (!%p521_p12), %s1337_s21, 4  ;;  %s605_s3 = scalar_lea.vmem (!%p521_p12), [#allocation4], %s1388_s27 }
  0x37   : > { %s841_s26 = sshll.u32 (!%p521_p12), %s605_s3, 4  ;;  %s611_s13 = scalar_lea.vmem (!%p521_p12), [#allocation6], %s1388_s27  ;;  %s1442_s26 = int_to_ptr.vmem [resolvable:$true] %s841_s26 }
  0x39   : > { %s613_s22 = scalar_select %p612_p13, %s1337_s21, 1  ;;  %v693_v8 = vld [vmem:[%s529_s25] sm:$0xff]  ;;  %v1076_v9 = vld [vmem:[%s529_s25 + $0x8] sm:$0xff]  ;;  %v1078_v10 = vld [vmem:[%s529_s25 + $0x10] sm:$0xff]  ;;  %vm663_vm0 = vcmask 130048   ;;  %vm736_vm1 = vcmask 31744  }
  0x3a   : > { %v694_v11 = vmul.f32 0.25, %v693_v8  ;;  %v699_v12 = vmul.f32 0.25, %v1076_v9  ;;  %v1080_v13 = vld [vmem:[%s529_s25 + $0x18] sm:$0xff]  ;;  %v695_v14 = vld [vmem:[%s536_s15] sm:$0xff]  ;;  %v707_v17 = vmul.f32 0.25, %v1078_v10  ;;  %v1077_v24 = vld [vmem:[%s536_s15 + $0x8] sm:$0xff] }
  0x3b   : > { %s1392_s24 = sshll.u32 %s613_s22, 3  ;;  %v766_v18 = vmul.f32 -0.3, %v693_v8  ;;  %v768_v19 = vmul.f32 -0.1, %v1076_v9  ;;  %v696_v23 = vmul.f32 0.0625, %v695_v14 }
  0x3c   : > { %s627_s12 = scalar_lea.vmem %s1518_s5, %s1392_s24  ;;  %s635_s2 = scalar_lea.vmem %s1520_s7, %s1392_s24  ;;  %v700_v16 = vadd.f32 %v699_v12, %v694_v11  ;;  %v715_v25 = vmul.f32 0.25, %v1080_v13  ;;  %v772_v27 = vmul.f32 0.1, %v1078_v10  ;;  %v1079_v28 = vld [vmem:[%s536_s15 + $0x10] sm:$0xff]  ;;  %v1081_v29 = vld [vmem:[%s536_s15 + $0x18] sm:$0xff]  ;;  %v703_v31 = vmul.f32 0.0625, %v1077_v24 }
  0x3d   : > { %v647_v15 = vld [vmem:[%s627_s12] sm:$0xff]  ;;  %s619_s19 = scalar_lea.vmem %s1514_s1, %s1392_s24  ;;  %s615_s25 = scalar_lea.vmem %s1513_s0, %s1392_s24  ;;  %v711_v32 = vmul.f32 0.0625, %v1079_v28  ;;  %v719_v37 = vmul.f32 0.0625, %v1081_v29  ;;  %v769_v38 = vadd.f32 %v768_v19, %v766_v18  ;;  %v767_v41 = vmul.f32 0.09, %v695_v14 }
  0x3e   : > { %s623_s12 = scalar_lea.vmem %s1517_s4, %s1392_s24  ;;  %1144 = vlog2.f32 %v647_v15  ;;  %v650_v20 = vmul.f32 2.0, %v647_v15  ;;  %v692_v21 = vld [vmem:[%s635_s2] sm:$0xff]  ;;  %s643_s18 = scalar_lea.vmem %s1522_s9, %s1392_s24  ;;  %v708_v35 = vadd.f32 %v707_v17, %v700_v16  ;;  %v704_v39 = vadd.f32 %v703_v31, %v696_v23 }
  0x3f   : > { %v645_v22 = vld [vmem:[%s619_s19] sm:$0xff]  ;;  %1146 = vlog2.f32 %v692_v21  ;;  %v723_v26 = vmul.f32 2.0, %v692_v21  ;;  %v770_v42 = vmul.f32 0.01, %v1077_v24  ;;  %s631_s15 = scalar_lea.vmem %s1519_s6, %s1392_s24  ;;  %v774_v43 = vmul.f32 0.01, %v1079_v28  ;;  %s639_s30 = scalar_lea.vmem %s1521_s8, %s1392_s24 }
  0x40   : > { %v651_v30 = vmul.f32 %v650_v20, %v647_v15  ;;  %1148 = vlog2.f32 %v645_v22  ;;  %v644_v33 = vld [vmem:[%s615_s25] sm:$0xff]  ;;  %v712_v45 = vadd.f32 %v711_v32, %v704_v39  ;;  %v778_v47 = vmul.f32 0.09, %v1081_v29  ;;  %s854_s21 = sshll.u32 %s611_s13, 4  ;;  %s1449_s21 = int_to_ptr.vmem [resolvable:$true] %s854_s21 }
  0x41   : > { %v646_v34 = vld [vmem:[%s623_s12] sm:$0xff]  ;;  %v724_v36 = vmul.f32 %v723_v26, %v692_v21  ;;  %v771_v46 = vadd.f32 %v770_v42, %v767_v41  ;;  %v716_v48 = vadd.f32 %v715_v25, %v708_v35  ;;  %v776_v51 = vmul.f32 0.3, %v1080_v13 }
  0x42   : > { %1150 = vrcp.f32 %v651_v30  ;;  %v765_v40 = vld [vmem:[%s643_s18] sm:$0xff]  ;;  %v653_v44 = vsub.f32 %v646_v34, %v644_v33  ;;  %v720_v52 = vadd.f32 %v719_v37, %v712_v45  ;;  %v773_v53 = vadd.f32 %v772_v27, %v769_v38 }
  0x43   : > { %1152 = vrcp.f32 %v724_v36  ;;  %v782_v49 = vmul.f32 2.0, %v765_v40  ;;  %v691_v50 = vld [vmem:[%s631_s15] sm:$0xff]  ;;  %v775_v54 = vadd.f32 %v774_v43, %v771_v46  ;;  %s1437_s15 = scalar_lea.hbm %s1523_s10, %s1084_s14 }
  0x44   : > { %1154 = vlog2.f32 %v765_v40  ;;  %v654_v56 = vmul.f32 %v653_v44, %v653_v44  ;;  %v726_v58 = vsub.f32 %v691_v50, %v716_v48  ;;  %v777_v59 = vadd.f32 %v776_v51, %v773_v53  ;;  %v764_v61 = vld [vmem:[%s639_s30] sm:$0xff] }
  0x45   : > { %v783_v55 = vmul.f32 %v782_v49, %v765_v40  ;;  %1156 = vlog2.f32 %v720_v52  ;;  %v779_v57 = vadd.f32 %v778_v47, %v775_v54 }
  0x46   : > { %v659_v0 = vadd.f32 %v654_v56, %v645_v22  ;;  %v727_v3 = vmul.f32 %v726_v58, %v726_v58  ;;  %v785_v6 = vsub.f32 %v764_v61, %v777_v59 }
  0x47   : > { %1158 = vrcp.f32 %v783_v55 }
  0x48   : > { %1160 = vlog2.f32 %v779_v57  ;;  %v786_v16 = vmul.f32 %v785_v6, %v785_v6  ;;  %v732_v21 = vadd.f32 %v727_v3, %v720_v52 }
  0x4a   : > { %v791_v27 = vadd.f32 %v786_v16, %v779_v57 }
  0x4b   : > { %v1145_v60 = vpop.eup %1144 }
  0x4c   : > { %v1147_v62 = vpop.eup %1146  ;;  %v649_v63 = vmul.f32 0.6931472, %v1145_v60 }
  0x4d   : > { %v1149_v1 = vpop.eup %1148  ;;  %v722_v2 = vmul.f32 0.6931472, %v1147_v62 }
  0x4e   : > { %v676_v4 = vadd.f32 0.9189385, %v649_v63  ;;  %v656_v5 = vmul.f32 0.6931472, %v1149_v1 }
  0x4f   : > { %v1151_v7 = vpop.eup %1150  ;;  %v749_v8 = vadd.f32 0.9189385, %v722_v2 }
  0x50   : > { %v1153_v9 = vpop.eup %1152  ;;  %v677_v10 = vmul.f32 %v1151_v7, %v654_v56  ;;  %v657_v11 = vmul.f32 0.5, %v656_v5  ;;  %v660_v12 = vmul.f32 %v1151_v7, %v659_v0 }
  0x51   : > { %v750_v13 = vmul.f32 %v1153_v9, %v727_v3  ;;  %v1155_v18 = vpop.eup %1154  ;;  %v733_v32 = vmul.f32 %v1153_v9, %v732_v21 }
  0x52   : > { %v678_v14 = vadd.f32 %v677_v10, %v676_v4  ;;  %v658_v15 = vsub.f32 %v649_v63, %v657_v11  ;;  %v1157_v22 = vpop.eup %1156  ;;  %v781_v29 = vmul.f32 0.6931472, %v1155_v18 }
  0x53   : > { %v751_v17 = vadd.f32 %v750_v13, %v749_v8  ;;  %v729_v26 = vmul.f32 0.6931472, %v1157_v22 }
  0x54   : > { %v679_v19 = vsel %vm663_vm0, %v678_v14, 0.0  ;;  %v661_v20 = vadd.f32 %v660_v12, %v658_v15  ;;  %v1159_v24 = vpop.eup %1158  ;;  %v807_v34 = vadd.f32 0.9189385, %v781_v29 }
  0x55   : > { %680 = vadd.xlane.f32.xlu0 %v679_v19  ;;  %v752_v23 = vsel %vm736_vm1, %v751_v17, 0.0  ;;  %v1161_v28 = vpop.eup %1160  ;;  %v730_v31 = vmul.f32 0.5, %v729_v26  ;;  %v792_v37 = vmul.f32 %v1159_v24, %v791_v27  ;;  %v808_v38 = vmul.f32 %v1159_v24, %v786_v16 }
  0x56   : > { %753 = vadd.xlane.f32.xlu1 %v752_v23  ;;  %v1075_v25 = vadd.f32 -0.5, %v661_v20  ;;  %v788_v33 = vmul.f32 0.6931472, %v1161_v28 }
  0x57   : > { %v731_v35 = vsub.f32 %v722_v2, %v730_v31  ;;  %v809_v43 = vadd.f32 %v808_v38, %v807_v34 }
  0x58   : > { %v664_v30 = vsel %vm663_vm0, %v1075_v25, 0.0  ;;  %v789_v36 = vmul.f32 0.5, %v788_v33 }
  0x59   : > { %665 = vadd.xlane.f32.xlu0 %v664_v30  ;;  %v734_v39 = vadd.f32 %v733_v32, %v731_v35  ;;  %v810_v47 = vsel %vm736_vm1, %v809_v43, 0.0 }
  0x5a   : > { %v790_v40 = vsub.f32 %v781_v29, %v789_v36 }
  0x5b   : > { %v1082_v41 = vadd.f32 -0.5, %v734_v39 }
  0x5c   : > { %v793_v42 = vadd.f32 %v792_v37, %v790_v40 }
  0x5d   : > { %v737_v44 = vsel %vm736_vm1, %v1082_v41, 0.0 }
  0x5e   : > { %v1083_v45 = vadd.f32 -0.5, %v793_v42  ;;  %738 = vadd.xlane.f32.xlu1 %v737_v44 }
  0x60   : > { %v795_v46 = vsel %vm736_vm1, %v1083_v45, 0.0 }
  0x61   : > { %796 = vadd.xlane.f32.xlu0 %v795_v46 }
  0x62   : > { %811 = vadd.xlane.f32.xlu1 %v810_v47 }
  0xde   : > { %v681_v48 = vpop.xlane.xlu0 %680 }
  0xdf   : > { %v682_v49 = vrot.slane %v681_v48, 4  ;;  %v754_v50 = vpop.xlane.xlu1 %753 }
  0xe0   : > { %v755_v52 = vrot.slane %v754_v50, 4 }
  0xe1   : > { %v683_v51 = vadd.f32 %v682_v49, %v681_v48 }
  0xe2   : > { %v666_v53 = vpop.xlane.xlu0 %665  ;;  %v756_v57 = vadd.f32 %v755_v52, %v754_v50 }
  0xe3   : > { %v684_v54 = vrot.slane %v683_v51, 2  ;;  %v667_v55 = vrot.slane %v666_v53, 4 }
  0xe4   : > { %v757_v61 = vrot.slane %v756_v57, 2 }
  0xe5   : > { %v668_v56 = vadd.f32 %v667_v55, %v666_v53  ;;  %v685_v58 = vadd.f32 %v684_v54, %v683_v51 }
  0xe6   : > { %v758_v8 = vadd.f32 %v757_v61, %v756_v57 }
  0xe7   : > { %v669_v59 = vrot.slane %v668_v56, 2  ;;  %v739_v62 = vpop.xlane.xlu1 %738  ;;  %v686_v63 = vrot.slane %v685_v58, 1 }
  0xe8   : > { %v740_v0 = vrot.slane %v739_v62, 4  ;;  %v759_v15 = vrot.slane %v758_v8, 1 }
  0xe9   : > { %v670_v60 = vadd.f32 %v669_v59, %v668_v56  ;;  %v687_v7 = vadd.f32 %v686_v63, %v685_v58 }
  0xea   : > { %v797_v2 = vpop.xlane.xlu0 %796  ;;  %v741_v3 = vadd.f32 %v740_v0, %v739_v62  ;;  %v760_v22 = vadd.f32 %v759_v15, %v758_v8 }
  0xeb   : > { %v671_v1 = vrot.slane %v670_v60, 1  ;;  %v798_v4 = vrot.slane %v797_v2, 4  ;;  %v812_v6 = vpop.xlane.xlu1 %811 }
  0xec   : > { %v742_v9 = vrot.slane %v741_v3, 2  ;;  %v813_v11 = vrot.slane %v812_v6, 4 }
  0xed   : > { %v672_v5 = vadd.f32 %v671_v1, %v670_v60  ;;  %v799_v10 = vadd.f32 %v798_v4, %v797_v2 }
  0xee   : > { %v814_v13 = vadd.f32 %v813_v11, %v812_v6  ;;  %v743_v14 = vadd.f32 %v742_v9, %v741_v3 }
  0xef   : > { %1088 = vpush %v672_v5  ;;  %v800_v12 = vrot.slane %v799_v10, 2 }
  0xf0   : > { %1090 = vpush %v687_v7  ;;  %v815_v17 = vrot.slane %v814_v13, 2  ;;  %v744_v18 = vrot.slane %v743_v14, 1 }
  0xf1   : > { %v801_v16 = vadd.f32 %v800_v12, %v799_v10 }
  0xf2   : > { %v816_v19 = vadd.f32 %v815_v17, %v814_v13  ;;  %v745_v20 = vadd.f32 %v744_v18, %v743_v14 }
  0xf3   : > { %v802_v21 = vrot.slane %v801_v16, 1 }
  0xf4   : > { %1092 = vpush %v745_v20  ;;  %v817_v24 = vrot.slane %v816_v19, 1 }
  0xf5   : > { %v803_v23 = vadd.f32 %v802_v21, %v801_v16  ;;  %1094 = vpush %v760_v22 }
  0xf6   : > { %v818_v25 = vadd.f32 %v817_v24, %v816_v19 }
  0xf7   : > { %1096 = vpush %v803_v23 }
  0xf8   : > { %1098 = vpush %v818_v25 }
 0x120   : > { %s1089_s24 = spop %1088 }
 0x121   : > { %s1091_s25 = spop %1090  ;;  %v674_v26 = vstv %s1089_s24 }
 0x122   : > { %v689_v30 = vstv %s1091_s25  ;;  %s1447_s25 = scalar_lea.hbm %s1524_s11, %s1084_s14 }
 0x125   : > { %s1093_s16 = spop %1092 }
 0x126   : > { %v747_v27 = vstv %s1093_s16  ;;  %s1095_s12 = spop %1094  ;;  %s825_s16 = scalar_lea.sflag [#allocation5], %s1388_s27 }
 0x127   : > { %v748_v28 = vadd.f32 %v747_v27, %v674_v26  ;;  %v762_v29 = vstv %s1095_s12  ;;  %s1162_s12 = scalar_lea.vmem %s1442_s26, 16 }
 0x128   : > { %s1097_s18 = spop %1096  ;;  %v763_v32 = vadd.f32 %v762_v29, %v689_v30  ;;  %p1163_p0 = scmp.ne.s32.totalorder %s1442_s26, %s1162_s12 }
 0x129   : > { %v805_v31 = vstv %s1097_s18  ;;  %s1099_s22 = spop %1098  ;;  %s1254_s18 = smov [#allocation4]  }
 0x12a   : > { %v806_v33 = vadd.f32 %v805_v31, %v748_v28  ;;  %v820_v34 = vstv %s1099_s22  ;;  %p1164_p1 = pnand %p1163_p0, %p1359_p6  ;;  %s1166_s2 = sshll.u32 %s1254_s18, 4  ;;  %s1167_s2 = int_to_ptr.vmem [resolvable:$false] %s1166_s2 }
 0x12b   : > { %v821_v35 = vadd.f32 %v820_v34, %v763_v32  ;;  %s1168_s19 = scalar_lea.vmem %s1167_s2, 32  ;;  %p1169_p3 = scmp.lt.s32.totalorder %s1442_s26, %s1167_s2 }
 0x12c   : > { %822 = vst [vmem:[%s605_s3] sm:$0x1] %v806_v33  ;;  %p1165_p2 = pneg %p1164_p1  ;;  %p1170_p4 = scmp.lt.s32.totalorder %s1168_s19, %s1162_s12 }
 0x12e   : > { %p1171_p5 = por %p1170_p4, %p1169_p3 }
 0x130   : > { %p1172_p7 = pnand %p1171_p5, %p1165_p2 }
 0x132   : > { %1175 = shalt.err (!%p1172_p7)
}
 0x133   : > { %s1176_s14 = scalar_lea.hbm %s1437_s15, 16  ;;  %s1180_s30 = scalar_lea.hbm %s1523_s10, 32 }
 0x134   : > { %p1177_p10 = scmp.ne.s32.totalorder %s1437_s15, %s1176_s14  ;;  %p1181_p13 = scmp.lt.s32.totalorder %s1437_s15, %s1523_s10 }
 0x135   : > { %p1182_p0 = scmp.lt.s32.totalorder %s1180_s30, %s1176_s14 }
 0x136   : > { %p1178_p11 = pnand %p1177_p10, %p1359_p6 }
 0x137   : > { %p1183_p1 = por %p1182_p0, %p1181_p13 }
 0x138   : > { %p1179_p12 = pneg %p1178_p11 }
 0x13a   : > { %p1184_p2 = pnand %p1183_p1, %p1179_p12 }
 0x13c   : > { %1187 = shalt.err (!%p1184_p2)
}
 0x13d   : > { %1100 = dma.vmem_to_hbm [thread:$0]  (%p1359_p6), %s1442_s26, 16, %s1437_s15, %s825_s16   ;;  %823 = vst [vmem:[%s611_s13] sm:$0x1] %v821_v35 }
 0x13e   : > { %s829_s12 = scalar_lea.sflag [#allocation7], %s1388_s27  ;;  %s1188_s2 = scalar_lea.vmem %s1449_s21, 16 }
 0x13f   : > { %p1189_p3 = scmp.ne.s32.totalorder %s1449_s21, %s1188_s2  ;;  %s1255_s19 = smov [#allocation6]  }
 0x140   : > { %s1192_s14 = sshll.u32 %s1255_s19, 4  ;;  %s1193_s14 = int_to_ptr.vmem [resolvable:$false] %s1192_s14 }
 0x141   : > { %p1190_p4 = pnand %p1189_p3, %p1359_p6  ;;  %s1194_s3 = scalar_lea.vmem %s1193_s14, 32 }
 0x142   : > { %p1195_p7 = scmp.lt.s32.totalorder %s1449_s21, %s1193_s14  ;;  %p1196_p10 = scmp.lt.s32.totalorder %s1194_s3, %s1188_s2 }
 0x143   : > { %p1191_p5 = pneg %p1190_p4 }
 0x144   : > { %p1197_p11 = por %p1196_p10, %p1195_p7 }
 0x146   : > { %p1198_p12 = pnand %p1197_p11, %p1191_p5 }
 0x148   : > { %1201 = shalt.err (!%p1198_p12)
}
 0x149   : > { %s1202_s26 = scalar_lea.hbm %s1447_s25, 16  ;;  %s1206_s13 = scalar_lea.hbm %s1524_s11, 32 }
 0x14a   : > { %p1203_p13 = scmp.ne.s32.totalorder %s1447_s25, %s1202_s26  ;;  %p1207_p2 = scmp.lt.s32.totalorder %s1447_s25, %s1524_s11 }
 0x14b   : > { %p1208_p3 = scmp.lt.s32.totalorder %s1206_s13, %s1202_s26 }
 0x14c   : > { %p1204_p0 = pnand %p1203_p13, %p1359_p6 }
 0x14d   : > { %p1209_p4 = por %p1208_p3, %p1207_p2 }
 0x14e   : > { %p1205_p1 = pneg %p1204_p0 }
 0x150   : > { %p1210_p5 = pnand %p1209_p4, %p1205_p1 }
 0x152   : > { %1213 = shalt.err (!%p1210_p5)
}
 0x153   : > { %1101 = dma.vmem_to_hbm [thread:$0]  (%p1359_p6), %s1449_s21, 16, %s1447_s25, %s829_s12  }
 0x154 PF: > { %s866_s30 = sand.u32 1, %s1240_s17   ;;  %p1105_p7 = pnand %p1059_p9, %p1363_p8 }
 0x155   : > { %s867_s24 = scalar_lea.sflag [#allocation5], %s866_s30 }
 0x156   : > { %p1106_p10 = pneg %p1105_p7 }
 0x158   : > { %1231 = dma.done.wait (%p1106_p10), %s867_s24, 16  }
 0x159   : > { %1233 = vsyncadd (%p1106_p10), %s867_s24, 4294967280  ;;  %s875_s18 = scalar_lea.sflag [#allocation7], %s866_s30 }
 0x15a   : > { %1235 = dma.done.wait (%p1106_p10), %s875_s18, 16  }
 0x15b   : > { %1237 = vsyncadd (%p1106_p10), %s875_s18, 4294967280  ;;  %s1537_s17 = sld [smem:[#allocation10_spill]]  ;;  %p25_p6 = scmp.ge.s32.totalorder %s1341_s23, 4  }
 0x15c   : > { %s1538_s18 = sld [smem:[#allocation11_spill]]  ;;  %s1540_s20 = smov %s1341_s23 }
 0x15d   : > { %s1539_s19 = sld [smem:[#allocation12_spill]]  ;;  %27 = sbr.rel (!%p25_p6) target bundleno = 8 (0x8), region = 231 }
 0x162   :  { %879 = vsyncpa [#allocation5], 1 }
 0x163   :  { %881 = vsyncpa [#allocation5 + $0x1], 1 }
 0x164   :  { %882 = vsyncpa [#allocation7], 1 }
 0x165   :  { %884 = vsyncpa [#allocation7 + $0x1], 1 }

</bundles_post_ra>
